<compile_context>
chip_gen: v7x
topology: tpu7x:2x2x1
jax: 0.10.0
libtpu: 0.0.40
codegen_flags: <defaults>
</compile_context>

<pallas_src>
import jax
import jax.numpy as jnp
from jax.experimental import pallas as pl
from jax.experimental.pallas import tpu as pltpu

_SLOPE = 0.2                 # LeakyReLU negative slope used by the Bi-GAE critic stacks
_TARGET_STEP_PX = 128 * 1024 # pixels per grid step we aim for (amortises ~0.35us step cost)


def _leaky_relu(h):
    return jnp.where(h > 0, h, _SLOPE * h)


def _joint_critic_kernel(x_ref, z_ref,
                         wx_ref, bx_ref, wz_ref, bz_ref,
                         wjx_ref, wjz_ref, bj_ref,
                         wo_ref, bo_ref,
                         o_ref):
    """One (bs, tile_px) block: bs images, tile_px pixels in the lane dim."""
    bs = x_ref.shape[0]

    def one_image(bi):
        xb = x_ref[bi]                                           # (Cx, tile_px)
        zb = z_ref[bi]                                           # (Cz, tile_px)
        # x_net / z_net: 1x1 conv (matmul over channels) + LeakyReLU, f32 accumulation.
        hx = _leaky_relu(
            jnp.dot(wx_ref[...], xb, preferred_element_type=jnp.float32)
            + bx_ref[...])                                       # (Hdim, tile_px)
        hz = _leaky_relu(
            jnp.dot(wz_ref[...], zb, preferred_element_type=jnp.float32)
            + bz_ref[...])                                       # (Hdim, tile_px)
        # joint_net layer 1 applied to torch.cat((hx, hz), dim=1):
        #   Wj @ [hx; hz] == Wj[:, :H] @ hx + Wj[:, H:] @ hz  (concat folded away)
        hj = _leaky_relu(
            jnp.dot(wjx_ref[...], hx, preferred_element_type=jnp.float32)
            + jnp.dot(wjz_ref[...], hz, preferred_element_type=jnp.float32)
            + bj_ref[...])                                       # (Hdim, tile_px)
        # joint_net layer 2: Hdim -> 1 critic score.  An M=1 MXU matmul wastes
        # 127/128 rows; use a VPU multiply + sublane (XLU) reduce instead.
        out = jnp.sum(wo_ref[...] * hj, axis=0, keepdims=True) + bo_ref[...]
        o_ref[bi] = out.astype(o_ref.dtype)                      # lane-dense (1, tile_px) store

    if bs == 1:
        one_image(0)
    else:
        @pl.loop(0, bs)
        def _(bi):
            one_image(bi)


def _vmem_budget_bytes():
    """Generation-aware scoped-VMEM budget (v7x only has 64 MiB physical)."""
    try:
        kind = jax.devices()[0].device_kind.lower()
    except Exception:
        kind = ""
    if "v7" in kind:
        return 48 * 1024 * 1024
    if "v5" in kind or "v6" in kind:
        return 96 * 1024 * 1024        # 128 MiB physical on v5e/v6e
    return 48 * 1024 * 1024            # unknown: conservative, fits every generation


def _largest_divisor_at_most(n, cap):
    cap = max(1, min(n, cap))
    for d in range(cap, 0, -1):
        if n % d == 0:
            return d
    return 1


def _plan_tiling(B, Cx, Cz, hdim, npix, vmem_budget):
    """Pick (batch_per_step, tile_px) so each grid step is VMEM-feasible and big."""
    f32 = 4
    usable = int(vmem_budget * 0.70)               # headroom for params / compiler scratch
    inter_px = 3 * hdim * f32                      # hx/hz/hj (reused across the bs loop)
    io_px_bs1 = 2 * (Cx + Cz + 1) * f32            # double-buffered x/z in + out, per image

    # Largest lane tile (multiple of 128) that fits VMEM with one image per step.
    max_tile = usable // (inter_px + io_px_bs1)
    max_tile = max(128, (max_tile // 128) * 128)

    if npix <= max_tile:
        tile_px = npix                             # whole image per step: never ragged, no pad
        # Pack multiple batch images per step to amortise the fixed grid-step cost.
        room = usable // tile_px - inter_px
        bs_vmem = max(1, room // (2 * (Cx + Cz + 1) * f32))
        bs_cap = max(1, _TARGET_STEP_PX // tile_px)
        bs = _largest_divisor_at_most(B, min(bs_vmem, bs_cap))
    else:
        tile_px = min(max_tile, max(128, (_TARGET_STEP_PX // 128) * 128))
        bs = 1

    # v7x has 2 TensorCores: make sure there are >= 2 parallel grid steps when possible.
    if (B // bs) * pl.cdiv(npix, tile_px) < 2:
        if B >= 2:
            bs = _largest_divisor_at_most(B, B // 2)
        elif npix >= 256:
            tile_px = max(128, (((npix + 1) // 2) // 128) * 128)  # ragged tail is masked
    return bs, tile_px


def joint_critic_forward(x, z, wx, bx, wz, bz, wj1, bj1, wj2, bj2):
    """Fused JointCritic forward.

    x   : (B, Cx, H, W) f32
    z   : (B, Cz, H, W) f32 (same spatial dims as x -- per-pixel critic)
    wx  : (Hdim, Cx),     bx : (Hdim,)   x_net 1x1 conv
    wz  : (Hdim, Cz),     bz : (Hdim,)   z_net 1x1 conv
    wj1 : (Hdim, 2*Hdim), bj1: (Hdim,)   joint_net conv on cat(x_out, z_out)
    wj2 : (1, Hdim),      bj2: (1,)      joint_net output conv
    returns critic scores (B, 1, H, W)
    """
    B, Cx, H, W = x.shape
    Bz, Cz, Hz, Wz = z.shape
    assert (Bz, Hz, Wz) == (B, H, W)
    hdim = wx.shape[0]
    npix = H * W

    vmem_budget = _vmem_budget_bytes()
    bs, tile_px = _plan_tiling(B, Cx, Cz, hdim, npix, vmem_budget)

    # Glue: pure reshapes only; NCHW layout kept (no transposes, no padding copies).
    x_flat = x.reshape(B, Cx, npix)
    z_flat = z.reshape(B, Cz, npix)

    # Fold torch.cat(dim=1) into a split weight; biases / output weight as sublane columns.
    wj1_x = wj1[:, :hdim]
    wj1_z = wj1[:, hdim:]
    bx_c = bx.reshape(hdim, 1)
    bz_c = bz.reshape(hdim, 1)
    bj_c = bj1.reshape(hdim, 1)
    wo_c = wj2.reshape(hdim, 1)
    bo_c = bj2.reshape(1, 1)

    grid = (B // bs, pl.cdiv(npix, tile_px))
    const = lambda b, i: (0, 0)  # resident params: block index never changes

    out_flat = pl.pallas_call(
        _joint_critic_kernel,
        out_shape=jax.ShapeDtypeStruct((B, 1, npix), x.dtype),
        grid_spec=pltpu.PrefetchScalarGridSpec(
            num_scalar_prefetch=0,
            grid=grid,
            in_specs=[
                pl.BlockSpec((bs, Cx, tile_px), lambda b, i: (b, 0, i)),  # x block
                pl.BlockSpec((bs, Cz, tile_px), lambda b, i: (b, 0, i)),  # z block
                pl.BlockSpec((hdim, Cx), const),      # wx
                pl.BlockSpec((hdim, 1), const),       # bx
                pl.BlockSpec((hdim, Cz), const),      # wz
                pl.BlockSpec((hdim, 1), const),       # bz
                pl.BlockSpec((hdim, hdim), const),    # wj1[:, :Hdim]
                pl.BlockSpec((hdim, hdim), const),    # wj1[:, Hdim:]
                pl.BlockSpec((hdim, 1), const),       # bj1
                pl.BlockSpec((hdim, 1), const),       # wj2 (as column)
                pl.BlockSpec((1, 1), const),          # bj2
            ],
            out_specs=pl.BlockSpec((bs, 1, tile_px), lambda b, i: (b, 0, i)),
        ),
        compiler_params=pltpu.CompilerParams(
            dimension_semantics=("parallel", "parallel"),
            vmem_limit_bytes=vmem_budget,
        ),
    )(x_flat, z_flat, wx, bx_c, wz, bz_c, wj1_x, wj1_z, bj_c, wo_c, bo_c)

    return out_flat.reshape(B, 1, H, W)


def _reference_forward(x, z, wx, bx, wz, bz, wj1, bj1, wj2, bj2):
    """Plain-JAX mirror of JointCritic.forward with the 1x1-conv instantiation."""
    def conv1x1(t, w, b):
        return jnp.einsum('oc,bchw->bohw', w, t) + b[None, :, None, None]
    hx = _leaky_relu(conv1x1(x, wx, bx))
    hz = _leaky_relu(conv1x1(z, wz, bz))
    joint = jnp.concatenate([hx, hz], axis=1)   # torch.cat((x_out, z_out), dim=1)
    hj = _leaky_relu(conv1x1(joint, wj1, bj1))
    return conv1x1(hj, wj2, bj2)


if __name__ == "__main__":
    key = jax.random.PRNGKey(0)
    B, Cx, Cz, H, W = 2, 4, 4, 16, 16
    hdim = 32

    ks = jax.random.split(key, 10)
    x = jax.random.normal(ks[0], (B, Cx, H, W), dtype=jnp.float32)
    z = jax.random.normal(ks[1], (B, Cz, H, W), dtype=jnp.float32)

    def w_init(k, o, i):
        return jax.random.normal(k, (o, i), dtype=jnp.float32) / jnp.sqrt(i)

    wx = w_init(ks[2], hdim, Cx)
    bx = 0.01 * jax.random.normal(ks[3], (hdim,), dtype=jnp.float32)
    wz = w_init(ks[4], hdim, Cz)
    bz = 0.01 * jax.random.normal(ks[5], (hdim,), dtype=jnp.float32)
    wj1 = w_init(ks[6], hdim, 2 * hdim)
    bj1 = 0.01 * jax.random.normal(ks[7], (hdim,), dtype=jnp.float32)
    wj2 = w_init(ks[8], 1, hdim)
    bj2 = 0.01 * jax.random.normal(ks[9], (1,), dtype=jnp.float32)

    fwd = jax.jit(joint_critic_forward)
    out = fwd(x, z, wx, bx, wz, bz, wj1, bj1, wj2, bj2)
    out = jax.block_until_ready(out)

    ref = _reference_forward(x, z, wx, bx, wz, bz, wj1, bj1, wj2, bj2)
    assert out.shape == (B, 1, H, W)
    assert jnp.allclose(out, ref, atol=1e-4, rtol=1e-4), float(
        jnp.max(jnp.abs(out - ref)))

    print("KERNEL_OK")
</pallas_src>

<mosaic_0001>
module attributes {stable_mosaic.version = 11 : i64} {
  func.func @_joint_critic_kernel(%arg0: i32, %arg1: i32, %arg2: memref<1x4x256xf32, #tpu.memory_space<vmem>>, %arg3: memref<1x4x256xf32, #tpu.memory_space<vmem>>, %arg4: memref<32x4xf32, #tpu.memory_space<vmem>>, %arg5: memref<32x1xf32, #tpu.memory_space<vmem>>, %arg6: memref<32x4xf32, #tpu.memory_space<vmem>>, %arg7: memref<32x1xf32, #tpu.memory_space<vmem>>, %arg8: memref<32x32xf32, #tpu.memory_space<vmem>>, %arg9: memref<32x32xf32, #tpu.memory_space<vmem>>, %arg10: memref<32x1xf32, #tpu.memory_space<vmem>>, %arg11: memref<32x1xf32, #tpu.memory_space<vmem>>, %arg12: memref<1x1xf32, #tpu.memory_space<vmem>>, %arg13: memref<1x1x256xf32, #tpu.memory_space<vmem>>) attributes {dimension_semantics = [#tpu.dimension_semantics<parallel>, #tpu.dimension_semantics<parallel>], iteration_bounds = array<i64: 2, 1>, scalar_prefetch = 0 : i64, scratch_operands = 0 : i64, tpu.core_type = #tpu.core_type<tc>, window_params = [{transform_indices = @transform_0, window_bounds = array<i64: 1, 4, 256>}, {transform_indices = @transform_1, window_bounds = array<i64: 1, 4, 256>}, {pipeline_mode = #tpu.pipeline_mode<synchronous>, transform_indices = @transform_2, window_bounds = array<i64: 32, 4>}, {pipeline_mode = #tpu.pipeline_mode<synchronous>, transform_indices = @transform_3, window_bounds = array<i64: 32, 1>}, {pipeline_mode = #tpu.pipeline_mode<synchronous>, transform_indices = @transform_4, window_bounds = array<i64: 32, 4>}, {pipeline_mode = #tpu.pipeline_mode<synchronous>, transform_indices = @transform_5, window_bounds = array<i64: 32, 1>}, {pipeline_mode = #tpu.pipeline_mode<synchronous>, transform_indices = @transform_6, window_bounds = array<i64: 32, 32>}, {pipeline_mode = #tpu.pipeline_mode<synchronous>, transform_indices = @transform_7, window_bounds = array<i64: 32, 32>}, {pipeline_mode = #tpu.pipeline_mode<synchronous>, transform_indices = @transform_8, window_bounds = array<i64: 32, 1>}, {pipeline_mode = #tpu.pipeline_mode<synchronous>, transform_indices = @transform_9, window_bounds = array<i64: 32, 1>}, {pipeline_mode = #tpu.pipeline_mode<synchronous>, transform_indices = @transform_10, window_bounds = array<i64: 1, 1>}, {transform_indices = @transform_11, window_bounds = array<i64: 1, 1, 256>}]} {
    %c0 = arith.constant 0 : index
    %c0_0 = arith.constant 0 : index
    %c0_1 = arith.constant 0 : index
    %0 = vector.load %arg2[%c0, %c0_0, %c0_1] : memref<1x4x256xf32, #tpu.memory_space<vmem>>, vector<1x4x256xf32>
    %1 = vector.shape_cast %0 : vector<1x4x256xf32> to vector<4x256xf32>
    %c0_2 = arith.constant 0 : index
    %c0_3 = arith.constant 0 : index
    %c0_4 = arith.constant 0 : index
    %2 = vector.load %arg3[%c0_2, %c0_3, %c0_4] : memref<1x4x256xf32, #tpu.memory_space<vmem>>, vector<1x4x256xf32>
    %3 = vector.shape_cast %2 : vector<1x4x256xf32> to vector<4x256xf32>
    %c0_5 = arith.constant 0 : index
    %c0_6 = arith.constant 0 : index
    %4 = vector.load %arg4[%c0_5, %c0_6] : memref<32x4xf32, #tpu.memory_space<vmem>>, vector<32x4xf32>
    %cst = arith.constant dense<0.000000e+00> : vector<32x256xf32>
    %5 = tpu.matmul %4, %1, %cst {dimension_numbers = #tpu.dot_dimension_numbers<[1], [0], [0], [1], [0, 0, 1, 1], [], []>} : vector<32x4xf32>, vector<4x256xf32>, vector<32x256xf32> -> vector<32x256xf32>
    %c0_7 = arith.constant 0 : index
    %c0_8 = arith.constant 0 : index
    %6 = vector.load %arg5[%c0_7, %c0_8] : memref<32x1xf32, #tpu.memory_space<vmem>>, vector<32x1xf32>
    %7 = vector.broadcast %6 : vector<32x1xf32> to vector<32x256xf32>
    %8 = arith.addf %5, %7 : vector<32x256xf32>
    %cst_9 = arith.constant 0.000000e+00 : f32
    %9 = vector.broadcast %cst_9 : f32 to vector<32x256xf32>
    %10 = arith.cmpf ogt, %8, %9 : vector<32x256xf32>
    %cst_10 = arith.constant 2.000000e-01 : f32
    %11 = vector.broadcast %cst_10 : f32 to vector<32x256xf32>
    %12 = arith.mulf %11, %8 : vector<32x256xf32>
    %13 = arith.select %10, %8, %12 : vector<32x256xi1>, vector<32x256xf32>
    %c0_11 = arith.constant 0 : index
    %c0_12 = arith.constant 0 : index
    %14 = vector.load %arg6[%c0_11, %c0_12] : memref<32x4xf32, #tpu.memory_space<vmem>>, vector<32x4xf32>
    %cst_13 = arith.constant dense<0.000000e+00> : vector<32x256xf32>
    %15 = tpu.matmul %14, %3, %cst_13 {dimension_numbers = #tpu.dot_dimension_numbers<[1], [0], [0], [1], [0, 0, 1, 1], [], []>} : vector<32x4xf32>, vector<4x256xf32>, vector<32x256xf32> -> vector<32x256xf32>
    %c0_14 = arith.constant 0 : index
    %c0_15 = arith.constant 0 : index
    %16 = vector.load %arg7[%c0_14, %c0_15] : memref<32x1xf32, #tpu.memory_space<vmem>>, vector<32x1xf32>
    %17 = vector.broadcast %16 : vector<32x1xf32> to vector<32x256xf32>
    %18 = arith.addf %15, %17 : vector<32x256xf32>
    %cst_16 = arith.constant 0.000000e+00 : f32
    %19 = vector.broadcast %cst_16 : f32 to vector<32x256xf32>
    %20 = arith.cmpf ogt, %18, %19 : vector<32x256xf32>
    %cst_17 = arith.constant 2.000000e-01 : f32
    %21 = vector.broadcast %cst_17 : f32 to vector<32x256xf32>
    %22 = arith.mulf %21, %18 : vector<32x256xf32>
    %23 = arith.select %20, %18, %22 : vector<32x256xi1>, vector<32x256xf32>
    %c0_18 = arith.constant 0 : index
    %c0_19 = arith.constant 0 : index
    %24 = vector.load %arg8[%c0_18, %c0_19] : memref<32x32xf32, #tpu.memory_space<vmem>>, vector<32x32xf32>
    %cst_20 = arith.constant dense<0.000000e+00> : vector<32x256xf32>
    %25 = tpu.matmul %24, %13, %cst_20 {dimension_numbers = #tpu.dot_dimension_numbers<[1], [0], [0], [1], [0, 0, 1, 1], [], []>} : vector<32x32xf32>, vector<32x256xf32>, vector<32x256xf32> -> vector<32x256xf32>
    %c0_21 = arith.constant 0 : index
    %c0_22 = arith.constant 0 : index
    %26 = vector.load %arg9[%c0_21, %c0_22] : memref<32x32xf32, #tpu.memory_space<vmem>>, vector<32x32xf32>
    %cst_23 = arith.constant dense<0.000000e+00> : vector<32x256xf32>
    %27 = tpu.matmul %26, %23, %cst_23 {dimension_numbers = #tpu.dot_dimension_numbers<[1], [0], [0], [1], [0, 0, 1, 1], [], []>} : vector<32x32xf32>, vector<32x256xf32>, vector<32x256xf32> -> vector<32x256xf32>
    %28 = arith.addf %25, %27 : vector<32x256xf32>
    %c0_24 = arith.constant 0 : index
    %c0_25 = arith.constant 0 : index
    %29 = vector.load %arg10[%c0_24, %c0_25] : memref<32x1xf32, #tpu.memory_space<vmem>>, vector<32x1xf32>
    %30 = vector.broadcast %29 : vector<32x1xf32> to vector<32x256xf32>
    %31 = arith.addf %28, %30 : vector<32x256xf32>
    %cst_26 = arith.constant 0.000000e+00 : f32
    %32 = vector.broadcast %cst_26 : f32 to vector<32x256xf32>
    %33 = arith.cmpf ogt, %31, %32 : vector<32x256xf32>
    %cst_27 = arith.constant 2.000000e-01 : f32
    %34 = vector.broadcast %cst_27 : f32 to vector<32x256xf32>
    %35 = arith.mulf %34, %31 : vector<32x256xf32>
    %36 = arith.select %33, %31, %35 : vector<32x256xi1>, vector<32x256xf32>
    %c0_28 = arith.constant 0 : index
    %c0_29 = arith.constant 0 : index
    %37 = vector.load %arg11[%c0_28, %c0_29] : memref<32x1xf32, #tpu.memory_space<vmem>>, vector<32x1xf32>
    %38 = vector.broadcast %37 : vector<32x1xf32> to vector<32x256xf32>
    %39 = arith.mulf %38, %36 : vector<32x256xf32>
    %cst_30 = arith.constant dense<0.000000e+00> : vector<256xf32>
    %40 = vector.multi_reduction <add>, %39, %cst_30 [0] : vector<32x256xf32> to vector<256xf32>
    %41 = vector.shape_cast %40 : vector<256xf32> to vector<1x256xf32>
    %c0_31 = arith.constant 0 : index
    %c0_32 = arith.constant 0 : index
    %42 = vector.load %arg12[%c0_31, %c0_32] : memref<1x1xf32, #tpu.memory_space<vmem>>, vector<1x1xf32>
    %43 = vector.broadcast %42 : vector<1x1xf32> to vector<1x256xf32>
    %44 = arith.addf %41, %43 : vector<1x256xf32>
    %c0_33 = arith.constant 0 : index
    %c0_34 = arith.constant 0 : index
    %c0_35 = arith.constant 0 : index
    %45 = vector.load %arg13[%c0_33, %c0_34, %c0_35] : memref<1x1x256xf32, #tpu.memory_space<vmem>>, vector<1x1x256xf32>
    %46 = vector.shape_cast %45 : vector<1x1x256xf32> to vector<1x256xf32>
    %47 = vector.shape_cast %44 : vector<1x256xf32> to vector<1x1x256xf32>
    tpu.vector_store %arg13[%c0_33, %c0_34, %c0_35], %47 {strides = array<i32>} : memref<1x1x256xf32, #tpu.memory_space<vmem>>, vector<1x1x256xf32>,
    return
  }
  func.func @transform_0(%arg0: i32, %arg1: i32) -> (i32, i32, i32) {
    %c0_i32 = arith.constant 0 : i32
    %c0_i32_0 = arith.constant 0 : i32
    return %arg0, %c0_i32, %arg1 : i32, i32, i32
  }
  func.func @transform_1(%arg0: i32, %arg1: i32) -> (i32, i32, i32) {
    %c0_i32 = arith.constant 0 : i32
    %c0_i32_0 = arith.constant 0 : i32
    return %arg0, %c0_i32, %arg1 : i32, i32, i32
  }
  func.func @transform_2(%arg0: i32, %arg1: i32) -> (i32, i32) {
    %c0_i32 = arith.constant 0 : i32
    %c0_i32_0 = arith.constant 0 : i32
    %c0_i32_1 = arith.constant 0 : i32
    return %c0_i32, %c0_i32_0 : i32, i32
  }
  func.func @transform_3(%arg0: i32, %arg1: i32) -> (i32, i32) {
    %c0_i32 = arith.constant 0 : i32
    %c0_i32_0 = arith.constant 0 : i32
    %c0_i32_1 = arith.constant 0 : i32
    return %c0_i32, %c0_i32_0 : i32, i32
  }
  func.func @transform_4(%arg0: i32, %arg1: i32) -> (i32, i32) {
    %c0_i32 = arith.constant 0 : i32
    %c0_i32_0 = arith.constant 0 : i32
    %c0_i32_1 = arith.constant 0 : i32
    return %c0_i32, %c0_i32_0 : i32, i32
  }
  func.func @transform_5(%arg0: i32, %arg1: i32) -> (i32, i32) {
    %c0_i32 = arith.constant 0 : i32
    %c0_i32_0 = arith.constant 0 : i32
    %c0_i32_1 = arith.constant 0 : i32
    return %c0_i32, %c0_i32_0 : i32, i32
  }
  func.func @transform_6(%arg0: i32, %arg1: i32) -> (i32, i32) {
    %c0_i32 = arith.constant 0 : i32
    %c0_i32_0 = arith.constant 0 : i32
    %c0_i32_1 = arith.constant 0 : i32
    return %c0_i32, %c0_i32_0 : i32, i32
  }
  func.func @transform_7(%arg0: i32, %arg1: i32) -> (i32, i32) {
    %c0_i32 = arith.constant 0 : i32
    %c0_i32_0 = arith.constant 0 : i32
    %c0_i32_1 = arith.constant 0 : i32
    return %c0_i32, %c0_i32_0 : i32, i32
  }
  func.func @transform_8(%arg0: i32, %arg1: i32) -> (i32, i32) {
    %c0_i32 = arith.constant 0 : i32
    %c0_i32_0 = arith.constant 0 : i32
    %c0_i32_1 = arith.constant 0 : i32
    return %c0_i32, %c0_i32_0 : i32, i32
  }
  func.func @transform_9(%arg0: i32, %arg1: i32) -> (i32, i32) {
    %c0_i32 = arith.constant 0 : i32
    %c0_i32_0 = arith.constant 0 : i32
    %c0_i32_1 = arith.constant 0 : i32
    return %c0_i32, %c0_i32_0 : i32, i32
  }
  func.func @transform_10(%arg0: i32, %arg1: i32) -> (i32, i32) {
    %c0_i32 = arith.constant 0 : i32
    %c0_i32_0 = arith.constant 0 : i32
    %c0_i32_1 = arith.constant 0 : i32
    return %c0_i32, %c0_i32_0 : i32, i32
  }
  func.func @transform_11(%arg0: i32, %arg1: i32) -> (i32, i32, i32) {
    %c0_i32 = arith.constant 0 : i32
    %c0_i32_0 = arith.constant 0 : i32
    return %arg0, %c0_i32, %arg1 : i32, i32, i32
  }
}

</mosaic_0001>

<bundles_post_ra>
// kernel: joint_critic_forward.1
= control target key start
LH: loop header
LB: loop body
LE: loop exit
PB: predicated region body
PF: predicated region fallthrough
CT: control target
= control target key end

     0   :  { %s1414_s19 = smov 0   ;;  %s1416_s20 = smov 0   ;;  %s1593_s0 = inlined_call_operand.vmem [shape: f32[2,4,256], index: 0, kind: input, shape index: {}]   ;;  %s1594_s1 = inlined_call_operand.vmem [shape: f32[2,4,256], index: 1, kind: input, shape index: {}]   ;;  %s1595_s2 = inlined_call_operand.vmem [shape: f32[32,4], index: 2, kind: input, shape index: {}]   ;;  %s1596_s3 = inlined_call_operand.vmem [shape: f32[32,1], index: 3, kind: input, shape index: {}]   ;;  %s1597_s4 = inlined_call_operand.vmem [shape: f32[32,4], index: 4, kind: input, shape index: {}]   ;;  %s1598_s5 = inlined_call_operand.vmem [shape: f32[32,1], index: 5, kind: input, shape index: {}]   ;;  %s1599_s6 = inlined_call_operand.vmem [shape: f32[32,32], index: 6, kind: input, shape index: {}]   ;;  %s1600_s7 = inlined_call_operand.vmem [shape: f32[32,32], index: 7, kind: input, shape index: {}]   ;;  %s1601_s8 = inlined_call_operand.vmem [shape: f32[32,1], index: 8, kind: input, shape index: {}]   ;;  %s1602_s9 = inlined_call_operand.vmem [shape: f32[32,1], index: 9, kind: input, shape index: {}]   ;;  %s1603_s10 = inlined_call_operand.<no memory space> [shape: f32[1,1], index: 10, kind: input, shape index: {}]   ;;  %s1604_s11 = inlined_call_operand.vmem [shape: f32[2,1,256], index: 11, kind: output, shape index: {}]  }
   0x1   :  { %v16_v0 = vstv %s1603_s10  ;;  %s1418_s21 = smov 0  }
   0x2   :  { %17 = vst [vmem:[#allocation2] sm:$0x1] %v16_v0 }
   0x3 LB: > { %s35_s10 = sadd.s32 1, %s1342_s20  ;;  %p1239_p0 = scmp.ge.s32.totalorder %s1346_s21, 1  ;;  %s1346_s21 = sphi %s1418_s21, %s23_s21   ;;  %s1342_s20 = sphi %s1416_s20, %s1606_s20   ;;  %s1338_s19 = sphi %s1414_s19, %s1605_s19  }
   0x4   : > { %p37_p1 = scmp.ge.s32.totalorder %s35_s10, 2  ;;  %p377_p2 = scmp.lt.s32.totalorder %s1346_s21, 3 }
   0x6   : > { %s1608_s10 = smov (%p37_p1, %s35_s10), 0  ;;  %p378_p3 = pnand %p1239_p0, %p377_p2 }
   0x7   : > { %p434_p4 = scmp.lt.s32.totalorder (!%p378_p3), %s1338_s19, 1  ;;  %v1348_v1 = vmov (!%p378_p3), 0.0   ;;  %v1349_v2 = vmov (!%p378_p3), 0   ;;  %v468_v3 = vld [vmem:[%s1596_s3] sm:$0xff] (!%p378_p3)  ;;  %v469_v5 = vld [vmem:[%s1596_s3 + $0x8] sm:$0xff] (!%p378_p3)  ;;  %vm507_vm0 = vcmask (!%p378_p3), 1043456  }
   0x8   : > { %381 = sbr.rel (%p378_p3) target bundleno = 518 (0x206), region = 64  ;;  %576 = vmatprep.mubr.f32.mxu0 (!%p378_p3), %v1348_v1  ;;  %735 = vmatprep.mubr.f32.mxu1 (!%p378_p3), %v1348_v1  ;;  %v629_v4 = vld [vmem:[%s1598_s5] sm:$0xff] (!%p378_p3)  ;;  %v630_v6 = vld [vmem:[%s1598_s5 + $0x8] sm:$0xff] (!%p378_p3)  ;;  %vm494_vm1 = vcmask (!%p378_p3), 31744   ;;  %v470_v13 = vld [vmem:[%s1596_s3 + $0x10] sm:$0xff] (!%p378_p3) }
   0x9   : > { %1320 = vset.pattern.permute.xlu0 (!%p378_p3), %v1349_v2  ;;  %1321 = vset.pattern.permute.xlu1 (!%p378_p3), %v1349_v2  ;;  %v464_v11 = vld [vmem:[%s1595_s2] sm:$0xff] (!%p378_p3)  ;;  %v471_v14 = vld [vmem:[%s1596_s3 + $0x18] sm:$0xff] (!%p378_p3)  ;;  %v465_v15 = vld [vmem:[%s1595_s2 + $0x8] sm:$0xff] (!%p378_p3) }
   0xa   : > { %474 = vperm.xlu0 (!%p378_p3), %1320, %v468_v3   ;;  %635 = vperm.xlu1 (!%p378_p3), %1321, %v629_v4   ;;  %v625_v12 = vld [vmem:[%s1597_s4] sm:$0xff] (!%p378_p3)  ;;  %v626_v16 = vld [vmem:[%s1597_s4 + $0x8] sm:$0xff] (!%p378_p3)  ;;  %v631_v17 = vld [vmem:[%s1598_s5 + $0x10] sm:$0xff] (!%p378_p3) }
   0xb   : > { %v632_v18 = vld [vmem:[%s1598_s5 + $0x18] sm:$0xff] (!%p378_p3)  ;;  %v466_v19 = vld [vmem:[%s1595_s2 + $0x10] sm:$0xff] (!%p378_p3)  ;;  %v995_v21 = vld [vmem:[%s1601_s8] sm:$0xff] (!%p378_p3) }
   0xc   : > { %v627_v20 = vld [vmem:[%s1597_s4 + $0x10] sm:$0xff] (!%p378_p3)  ;;  %v996_v22 = vld [vmem:[%s1601_s8 + $0x8] sm:$0xff] (!%p378_p3)  ;;  %v467_v23 = vld [vmem:[%s1595_s2 + $0x18] sm:$0xff] (!%p378_p3) }
   0xd   : > { %v628_v24 = vld [vmem:[%s1597_s4 + $0x18] sm:$0xff] (!%p378_p3)  ;;  %v997_v25 = vld [vmem:[%s1601_s8 + $0x10] sm:$0xff] (!%p378_p3)  ;;  %v1051_v27 = vld [vmem:[%s1602_s9] sm:$0xff] (!%p378_p3) }
   0xe   : > { %479 = vperm.xlu0 (!%p378_p3), %1320, %v469_v5   ;;  %640 = vperm.xlu1 (!%p378_p3), %1321, %v630_v6   ;;  %v998_v26 = vld [vmem:[%s1601_s8 + $0x18] sm:$0xff] (!%p378_p3)  ;;  %v1052_v28 = vld [vmem:[%s1602_s9 + $0x8] sm:$0xff] (!%p378_p3)  ;;  %v1053_v29 = vld [vmem:[%s1602_s9 + $0x10] sm:$0xff] (!%p378_p3) }
   0xf   : > { %s1610_s19 = smov (!%p434_p4, %s1338_s19), 1  ;;  %v1054_v30 = vld [vmem:[%s1602_s9 + $0x18] sm:$0xff]  ;;  %v1101_v31 = vld [vmem:[#allocation2] sm:$0x1] }
  0x10   : > { %s1267_s26 = sshll.u32 %s1610_s19, 3 }
  0x11   : > { %s441_s29 = scalar_lea.vmem %s1593_s0, %s1267_s26  ;;  %s451_s17 = scalar_lea.vmem %s1594_s1, %s1267_s26 }
  0x12   : > { %v462_v7 = vld [vmem:[%s441_s29] sm:$0xff]  ;;  %484 = vperm.xlu0 %1320, %v470_v13   ;;  %489 = vperm.xlu1 %1321, %v471_v14   ;;  %s1244_s29 = sshll.u32 %s1610_s19, 1 }
  0x13   : > { %v493_v8 = vcombine.high %v462_v7, %v462_v7  ;;  %v463_v9 = vld [vmem:[%s451_s17] sm:$0xff]  ;;  %s460_s13 = scalar_lea.vmem %s1604_s11, %s1244_s29 }
  0x14   : > { %v654_v10 = vcombine.high %v463_v9, %v463_v9 }
  0x15   : > { %1245 = vmatprep.subr.msk.mxu0 %vm507_vm0, %v493_v8 }
  0x16   : > { %1251 = vmatprep.subr.msk.mxu1 %vm507_vm0, %v654_v10  ;;  %1246 = vmatpush1.msk.msra.mxu0 %vm507_vm0, %v462_v7 }
  0x17   : > { %1252 = vmatpush1.msk.msra.mxu1 %vm507_vm0, %v463_v9  ;;  %1247 = vmatmul.mubr.msk.f32.vlgmr.msra.gmra.mrb[0].mxu0 %vm494_vm1, %v464_v11 }
  0x18   : > { %1253 = vmatmul.mubr.msk.f32.vlgmr.msra.gmra.mrb[0].mxu1 %vm494_vm1, %v625_v12  ;;  %582 = vmatprep.mubr.f32.mxu0 %v1348_v1 }
  0x19   : > { %741 = vmatprep.mubr.f32.mxu1 %v1348_v1  ;;  %645 = vperm.xlu0 %1320, %v631_v17  }
  0x1a   : > { %650 = vperm.xlu1 %1321, %v632_v18  }
  0x1b   : > { %1248 = vmatmul.mubr.msk.f32.gmra.mrb[2].mxu0 %vm494_vm1, %v465_v15 }
  0x1c   : > { %1254 = vmatmul.mubr.msk.f32.gmra.mrb[2].mxu1 %vm494_vm1, %v626_v16  ;;  %588 = vmatprep.mubr.f32.mxu0 %v1348_v1 }
  0x1d   : > { %747 = vmatprep.mubr.f32.mxu1 %v1348_v1  ;;  %1001 = vperm.xlu0 %1320, %v995_v21  }
  0x1e   : > { %1006 = vperm.xlu1 %1321, %v996_v22  }
  0x1f   : > { %1249 = vmatmul.mubr.msk.f32.gmra.mrb[4].mxu0 %vm494_vm1, %v466_v19 }
  0x20   : > { %1255 = vmatmul.mubr.msk.f32.gmra.mrb[4].mxu1 %vm494_vm1, %v627_v20  ;;  %594 = vmatprep.mubr.f32.mxu0 %v1348_v1 }
  0x21   : > { %753 = vmatprep.mubr.f32.mxu1 %v1348_v1  ;;  %1011 = vperm.xlu0 %1320, %v997_v25  }
  0x22   : > { %1016 = vperm.xlu1 %1321, %v998_v26  }
  0x23   : > { %1250 = vmatmul.mubr.msk.f32.gmra.mrb[6].mxu0 %vm494_vm1, %v467_v23 }
  0x24   : > { %1256 = vmatmul.mubr.msk.f32.gmra.mrb[6].mxu1 %vm494_vm1, %v628_v24  ;;  %970 = vmatprep.mubr.f32.mxu0 %v1348_v1 }
  0x25   : > { %869 = vmatprep.mubr.f32.mxu1 %v1348_v1  ;;  %1057 = vperm.xlu0 %1320, %v1051_v27  }
  0x26   : > { %1062 = vperm.xlu1 %1321, %v1052_v28  }
  0x29   : > { %1067 = vperm.xlu0 %1320, %v1053_v29  }
  0x2a   : > { %1072 = vperm.xlu1 %1321, %v1054_v30  }
  0x2d   : > { %1104 = vperm.xlu0 %1320, %v1101_v31  }
  0x89   : > { %v475_v32 = vpop.permute.xlu0 %474  ;;  %v636_v33 = vpop.permute.xlu1 %635 }
  0x8d   : > { %v480_v34 = vpop.permute.xlu0 %479  ;;  %v641_v39 = vpop.permute.xlu1 %640 }
  0x91   : > { %v485_v43 = vpop.permute.xlu0 %484  ;;  %v490_v58 = vpop.permute.xlu1 %489 }
  0x98   : > { %v646_v61 = vpop.permute.xlu0 %645 }
  0x99   : > { %v651_v20 = vpop.permute.xlu1 %650 }
  0xea   : > { %v578_v35 = vpop.f32.mrb[0].mxu0 }
  0xeb   : > { %v579_v36 = vadd.f32 %v578_v35, %v475_v32  ;;  %v737_v37 = vpop.f32.mrb[0].mxu1  ;;  %v580_v38 = vpop.f32.mrb[1].mxu0 }
  0xec   : > { %v738_v40 = vadd.f32 %v737_v37, %v636_v33  ;;  %v581_v41 = vadd.f32 %v580_v38, %v475_v32  ;;  %v739_v42 = vpop.f32.mrb[1].mxu1 }
  0xed   : > { %v609_v44 = vmul.f32 0.2, %v579_v36  ;;  %v740_v45 = vadd.f32 %v739_v42, %v636_v33  ;;  %vm601_vm2 = vcmp.gt.f32.partialorder %v579_v36, 0.0 }
  0xee   : > { %vm760_vm3 = vcmp.gt.f32.partialorder %v738_v40, 0.0  ;;  %v768_v46 = vmul.f32 0.2, %v738_v40  ;;  %v584_v47 = vpop.f32.mrb[2].mxu0  ;;  %vm602_vm4 = vcmp.gt.f32.partialorder %v581_v41, 0.0 }
  0xef   : > { %v743_v48 = vpop.f32.mrb[2].mxu1  ;;  %v610_v49 = vmul.f32 0.2, %v581_v41  ;;  %v585_v50 = vadd.f32 %v584_v47, %v480_v34  ;;  %v586_v52 = vpop.f32.mrb[3].mxu0  ;;  %v1531_v54 = vsel %vm601_vm2, %v579_v36, %v609_v44  ;;  %v769_v55 = vmul.f32 0.2, %v740_v45 }
  0xf0   : > { %v744_v51 = vadd.f32 %v743_v48, %v641_v39  ;;  %v745_v53 = vpop.f32.mrb[3].mxu1  ;;  %v587_v56 = vadd.f32 %v586_v52, %v480_v34  ;;  %vm761_vm7 = vcmp.gt.f32.partialorder %v740_v45, 0.0  ;;  %v776_v0 = vsel %vm760_vm3, %v738_v40, %v768_v46  ;;  %v789_v52 = vld [vmem:[%s1600_s7 + $0x8] sm:$0xff] }
  0xf1   : > { %v746_v57 = vadd.f32 %v745_v53, %v641_v39  ;;  %vm603_vm5 = vcmp.gt.f32.partialorder %v585_v50, 0.0  ;;  %v611_v59 = vmul.f32 0.2, %v585_v50  ;;  %v777_v17 = vsel %vm761_vm7, %v740_v45, %v769_v55  ;;  %v786_v53 = vld [vmem:[%s1599_s6 + $0x10] sm:$0xff]  ;;  %v787_v55 = vld [vmem:[%s1599_s6 + $0x18] sm:$0xff] }
  0xf2   : > { %vm762_vm6 = vcmp.gt.f32.partialorder %v744_v51, 0.0  ;;  %v770_v60 = vmul.f32 0.2, %v744_v51  ;;  %v612_v62 = vmul.f32 0.2, %v587_v56  ;;  %vm604_vm9 = vcmp.gt.f32.partialorder %v587_v56, 0.0 }
  0xf3   : > { %vm763_vm8 = vcmp.gt.f32.partialorder %v746_v57, 0.0  ;;  %v771_v63 = vmul.f32 0.2, %v746_v57  ;;  %v619_v2 = vsel %vm603_vm5, %v585_v50, %v611_v59  ;;  %v590_v4 = vpop.f32.mrb[4].mxu0  ;;  %v749_v5 = vpop.f32.mrb[4].mxu1  ;;  %v618_v18 = vsel %vm602_vm4, %v581_v41, %v610_v49  ;;  %v784_v49 = vld [vmem:[%s1599_s6] sm:$0xff] }
  0xf4   : > { %v778_v3 = vsel %vm762_vm6, %v744_v51, %v770_v60  ;;  %v1279_v6 = vpack.c.bf16 %v619_v2, %v1531_v54  ;;  %v591_v8 = vadd.f32 %v590_v4, %v485_v43  ;;  %v750_v9 = vadd.f32 %v749_v5, %v646_v61  ;;  %v592_v10 = vpop.f32.mrb[5].mxu0  ;;  %v751_v11 = vpop.f32.mrb[5].mxu1  ;;  %v788_v50 = vld [vmem:[%s1600_s7] sm:$0xff]  ;;  %v785_v51 = vld [vmem:[%s1599_s6 + $0x8] sm:$0xff]  ;;  %v790_v54 = vld [vmem:[%s1600_s7 + $0x10] sm:$0xff] }
  0xf5   : > { %v1271_v7 = vpack.c.bf16 %v778_v3, %v776_v0  ;;  %v593_v12 = vadd.f32 %v592_v10, %v485_v43  ;;  %v752_v13 = vadd.f32 %v751_v11, %v646_v61  ;;  %v779_v15 = vsel %vm763_vm8, %v746_v57, %v771_v63  ;;  %v1002_v57 = vpop.permute.xlu0 %1001 }
  0xf6   : > { %v596_v14 = vpop.f32.mrb[6].mxu0  ;;  %v613_v16 = vmul.f32 0.2, %v591_v8  ;;  %v620_v19 = vsel %vm604_vm9, %v587_v56, %v612_v62  ;;  %vm605_vm10 = vcmp.gt.f32.partialorder %v591_v8, 0.0  ;;  %vm764_vm11 = vcmp.gt.f32.partialorder %v750_v9, 0.0  ;;  %v791_v56 = vld [vmem:[%s1600_s7 + $0x18] sm:$0xff] }
  0xf7   : > { %v772_v21 = vmul.f32 0.2, %v750_v9  ;;  %vm606_vm12 = vcmp.gt.f32.partialorder %v593_v12, 0.0  ;;  %v614_v22 = vmul.f32 0.2, %v593_v12  ;;  %vm765_vm13 = vcmp.gt.f32.partialorder %v752_v13, 0.0 }
  0xf8   : > { %v597_v23 = vadd.f32 %v596_v14, %v490_v58  ;;  %v755_v24 = vpop.f32.mrb[6].mxu1  ;;  %v598_v25 = vpop.f32.mrb[7].mxu0  ;;  %v1269_v26 = vpack.c.bf16 %v779_v15, %v777_v17  ;;  %v773_v27 = vmul.f32 0.2, %v752_v13  ;;  %v1277_v31 = vpack.c.bf16 %v620_v19, %v618_v18 }
  0xf9   : > { %v756_v28 = vadd.f32 %v755_v24, %v651_v20  ;;  %v599_v29 = vadd.f32 %v598_v25, %v490_v58  ;;  %v757_v30 = vpop.f32.mrb[7].mxu1  ;;  %v621_v32 = vsel %vm605_vm10, %v591_v8, %v613_v16  ;;  %v780_v37 = vsel %vm764_vm11, %v750_v9, %v772_v21  ;;  %v1007_v58 = vpop.permute.xlu1 %1006 }
  0xfa   : > { %vm607_vm14 = vcmp.gt.f32.partialorder %v597_v23, 0.0  ;;  %v615_v33 = vmul.f32 0.2, %v597_v23  ;;  %v758_v34 = vadd.f32 %v757_v30, %v651_v20  ;;  %1270 = vmatprep.subr.bf16.mxu1 %v1269_v26  ;;  %1278 = vmatprep.subr.bf16.mxu0 %v1277_v31  ;;  %v622_v42 = vsel %vm606_vm12, %v593_v12, %v614_v22  ;;  %v1012_v2 = vpop.permute.xlu0 %1011 }
  0xfb   : > { %vm766_vm15 = vcmp.gt.f32.partialorder %v756_v28, 0.0  ;;  %v774_v35 = vmul.f32 0.2, %v756_v28  ;;  %vm608_vm0 = vcmp.gt.f32.partialorder %v599_v29, 0.0  ;;  %v616_v36 = vmul.f32 0.2, %v599_v29  ;;  %1272 = vmatpush1.bf16.msra.mxu1 %v1271_v7  ;;  %1280 = vmatpush1.bf16.msra.mxu0 %v1279_v6 }
  0xfc   : > { %v623_v38 = vsel %vm607_vm14, %v597_v23, %v615_v33  ;;  %vm767_vm1 = vcmp.gt.f32.partialorder %v758_v34, 0.0  ;;  %v775_v39 = vmul.f32 0.2, %v758_v34  ;;  %v781_v45 = vsel %vm765_vm13, %v752_v13, %v773_v27 }
  0xfd   : > { %v1283_v40 = vpack.c.bf16 %v623_v38, %v621_v32  ;;  %v782_v41 = vsel %vm766_vm15, %v756_v28, %v774_v35  ;;  %v624_v43 = vsel %vm608_vm0, %v599_v29, %v616_v36  ;;  %vm792_vm2 = vcmask 261120   ;;  %v1017_v7 = vpop.permute.xlu1 %1016 }
  0xfe   : > { %v1275_v44 = vpack.c.bf16 %v782_v41, %v780_v37  ;;  %v783_v46 = vsel %vm767_vm1, %v758_v34, %v775_v39  ;;  %v1281_v47 = vpack.c.bf16 %v624_v43, %v622_v42  ;;  %v1058_v19 = vpop.permute.xlu0 %1057 }
  0xff   : > { %v1273_v48 = vpack.c.bf16 %v783_v46, %v781_v45 }
 0x100   : > { %1282 = vmatprep.subr.bf16.mxu0 %v1281_v47 }
 0x101   : > { %1274 = vmatprep.subr.bf16.mxu1 %v1273_v48  ;;  %1284 = vmatpush1.bf16.msra.mxu0 %v1283_v40  ;;  %v1063_v26 = vpop.permute.xlu1 %1062 }
 0x102   : > { %1276 = vmatpush1.bf16.msra.mxu1 %v1275_v44  ;;  %v1068_v44 = vpop.permute.xlu0 %1067 }
 0x104   : > { %1261 = vmatmul.mubr.msk.f32.vlgmr.msra.gmra.mrb[8].mxu0 %vm792_vm2, %v784_v49 }
 0x105   : > { %1257 = vmatmul.mubr.msk.f32.vlgmr.msra.gmra.mrb[8].mxu1 %vm792_vm2, %v788_v50  ;;  %976 = vmatprep.mubr.f32.mxu0 %v1348_v1 }
 0x106   : > { %875 = vmatprep.mubr.f32.mxu1 %v1348_v1 }
 0x108   : > { %1262 = vmatmul.mubr.msk.f32.gmra.mrb[10].mxu0 %vm792_vm2, %v785_v51 }
 0x109   : > { %1258 = vmatmul.mubr.msk.f32.gmra.mrb[10].mxu1 %vm792_vm2, %v789_v52  ;;  %982 = vmatprep.mubr.f32.mxu0 %v1348_v1 }
 0x10a   : > { %881 = vmatprep.mubr.f32.mxu1 %v1348_v1 }
 0x10c   : > { %1263 = vmatmul.mubr.msk.f32.gmra.mrb[12].mxu0 %vm792_vm2, %v786_v53 }
 0x10d   : > { %1259 = vmatmul.mubr.msk.f32.gmra.mrb[12].mxu1 %vm792_vm2, %v790_v54  ;;  %988 = vmatprep.mubr.f32.mxu0 %v1348_v1 }
 0x10e   : > { %887 = vmatprep.mubr.f32.mxu1 %v1348_v1 }
 0x110   : > { %1264 = vmatmul.mubr.msk.f32.gmra.mrb[14].mxu0 %vm792_vm2, %v787_v55  ;;  %v1073_v55 = vpop.permute.xlu1 %1072 }
 0x111   : > { %1260 = vmatmul.mubr.msk.f32.gmra.mrb[14].mxu1 %vm792_vm2, %v791_v56 }
 0x1d7   : > { %v972_v59 = vpop.f32.mrb[8].mxu0 }
 0x1d8   : > { %v871_v60 = vpop.f32.mrb[8].mxu1  ;;  %v974_v61 = vpop.f32.mrb[9].mxu0 }
 0x1d9   : > { %v973_v62 = vadd.f32 %v972_v59, %v871_v60  ;;  %v873_v63 = vpop.f32.mrb[9].mxu1 }
 0x1da   : > { %v975_v0 = vadd.f32 %v974_v61, %v873_v63  ;;  %v1107_v61 = vlaneseq }
 0x1db   : > { %v1019_v3 = vadd.f32 %v1002_v57, %v973_v62  ;;  %v978_v4 = vpop.f32.mrb[10].mxu0 }
 0x1dc   : > { %v1020_v1 = vadd.f32 %v1002_v57, %v975_v0  ;;  %v877_v5 = vpop.f32.mrb[10].mxu1  ;;  %v980_v6 = vpop.f32.mrb[11].mxu0  ;;  %vm1133_vm11 = vcmp.lt.s32.totalorder %v1107_v61, 256 }
 0x1dd   : > { %vm1027_vm3 = vcmp.gt.f32.partialorder %v1019_v3, 0.0  ;;  %v1035_v8 = vmul.f32 0.2, %v1019_v3  ;;  %v979_v9 = vadd.f32 %v978_v4, %v877_v5  ;;  %v879_v10 = vpop.f32.mrb[11].mxu1 }
 0x1de   : > { %vm1028_vm4 = vcmp.gt.f32.partialorder %v1020_v1, 0.0  ;;  %v1036_v11 = vmul.f32 0.2, %v1020_v1  ;;  %v981_v12 = vadd.f32 %v980_v6, %v879_v10  ;;  %v1350_v6 = vmov 1966171168  }
 0x1df   : > { %v1021_v13 = vadd.f32 %v1007_v58, %v979_v9  ;;  %v984_v14 = vpop.f32.mrb[12].mxu0  ;;  %v1043_v15 = vsel %vm1027_vm3, %v1019_v3, %v1035_v8  ;;  %v1108_v3 = vshrl.u32 %v1107_v61, 7 }
 0x1e0   : > { %v1022_v16 = vadd.f32 %v1007_v58, %v981_v12  ;;  %v883_v17 = vpop.f32.mrb[12].mxu1  ;;  %v986_v18 = vpop.f32.mrb[13].mxu0  ;;  %v1044_v20 = vsel %vm1028_vm4, %v1020_v1, %v1036_v11  ;;  %v1075_v27 = vmul.f32 %v1058_v19, %v1043_v15 }
 0x1e1   : > { %vm1029_vm5 = vcmp.gt.f32.partialorder %v1021_v13, 0.0  ;;  %v1037_v21 = vmul.f32 0.2, %v1021_v13  ;;  %v985_v22 = vadd.f32 %v984_v14, %v883_v17  ;;  %v885_v23 = vpop.f32.mrb[13].mxu1  ;;  %v1076_v31 = vmul.f32 %v1058_v19, %v1044_v20  ;;  %v1105_v11 = vpop.permute.xlu0 %1104 }
 0x1e2   : > { %vm1030_vm6 = vcmp.gt.f32.partialorder %v1022_v16, 0.0  ;;  %v1038_v24 = vmul.f32 0.2, %v1022_v16  ;;  %v987_v25 = vadd.f32 %v986_v18, %v885_v23  ;;  %v1109_v9 = vsub.s32 0, %v1108_v3 }
 0x1e3   : > { %v1045_v28 = vsel %vm1029_vm5, %v1021_v13, %v1037_v21  ;;  %v1023_v29 = vadd.f32 %v1012_v2, %v985_v22  ;;  %v990_v30 = vpop.f32.mrb[14].mxu0 }
 0x1e4   : > { %v1077_v32 = vmul.f32 %v1063_v26, %v1045_v28  ;;  %v1046_v33 = vsel %vm1030_vm6, %v1022_v16, %v1038_v24  ;;  %v1024_v34 = vadd.f32 %v1012_v2, %v987_v25  ;;  %v889_v35 = vpop.f32.mrb[14].mxu1  ;;  %v992_v36 = vpop.f32.mrb[15].mxu0  ;;  %v1110_v16 = vrot.slane %v1105_v11, %v1109_v9 }
 0x1e5   : > { %v1078_v37 = vmul.f32 %v1063_v26, %v1046_v33  ;;  %vm1031_vm7 = vcmp.gt.f32.partialorder %v1023_v29, 0.0  ;;  %v1039_v38 = vmul.f32 0.2, %v1023_v29  ;;  %v991_v39 = vadd.f32 %v990_v30, %v889_v35  ;;  %v891_v40 = vpop.f32.mrb[15].mxu1 }
 0x1e6   : > { %v1083_v41 = vadd.f32 %v1077_v32, %v1075_v27  ;;  %vm1032_vm8 = vcmp.gt.f32.partialorder %v1024_v34, 0.0  ;;  %v1040_v42 = vmul.f32 0.2, %v1024_v34  ;;  %v993_v43 = vadd.f32 %v992_v36, %v891_v40 }
 0x1e7   : > { %v1092_v45 = vadd.f32 %v1078_v37, %v1076_v31  ;;  %v1047_v46 = vsel %vm1031_vm7, %v1023_v29, %v1039_v38  ;;  %v1025_v47 = vadd.f32 %v1017_v7, %v991_v39 }
 0x1e8   : > { %v1079_v48 = vmul.f32 %v1068_v44, %v1047_v46  ;;  %v1048_v49 = vsel %vm1032_vm8, %v1024_v34, %v1040_v42  ;;  %v1026_v50 = vadd.f32 %v1017_v7, %v993_v43  ;;  %v1117_v7 = vunpack.c.l.s4 %v1350_v6 }
 0x1e9   : > { %v1080_v51 = vmul.f32 %v1068_v44, %v1048_v49  ;;  %vm1033_vm9 = vcmp.gt.f32.partialorder %v1025_v47, 0.0  ;;  %v1041_v52 = vmul.f32 0.2, %v1025_v47 }
 0x1ea   : > { %v1084_v53 = vadd.f32 %v1083_v41, %v1079_v48  ;;  %vm1034_vm10 = vcmp.gt.f32.partialorder %v1026_v50, 0.0  ;;  %v1042_v54 = vmul.f32 0.2, %v1026_v50  ;;  %v1118_v14 = vunpack.c.0.s8 %v1117_v7 }
 0x1eb   : > { %v1093_v56 = vadd.f32 %v1092_v45, %v1080_v51  ;;  %v1049_v57 = vsel %vm1033_vm9, %v1025_v47, %v1041_v52 }
 0x1ec   : > { %v1081_v58 = vmul.f32 %v1073_v55, %v1049_v57  ;;  %v1050_v59 = vsel %vm1034_vm10, %v1026_v50, %v1042_v54  ;;  %v1121_v20 = vsub.s32 %v1118_v14, %v1108_v3 }
 0x1ed   : > { %v1082_v60 = vmul.f32 %v1073_v55, %v1050_v59 }
 0x1ee   : > { %v1085_v62 = vadd.f32 %v1084_v53, %v1081_v58 }
 0x1ef   : > { %v1094_v63 = vadd.f32 %v1093_v56, %v1082_v60 }
 0x1f0   : > { %v1086_v0 = vrot.slane %v1085_v62, 4 }
 0x1f1   : > { %v1095_v2 = vrot.slane %v1094_v63, 4 }
 0x1f2   : > { %v1087_v4 = vadd.f32 %v1086_v0, %v1085_v62 }
 0x1f3   : > { %v1096_v1 = vadd.f32 %v1095_v2, %v1094_v63 }
 0x1f4   : > { %v1088_v5 = vrot.slane %v1087_v4, 2 }
 0x1f5   : > { %v1097_v8 = vrot.slane %v1096_v1, 2 }
 0x1f6   : > { %v1089_v10 = vadd.f32 %v1088_v5, %v1087_v4 }
 0x1f7   : > { %v1098_v12 = vadd.f32 %v1097_v8, %v1096_v1 }
 0x1f8   : > { %v1090_v13 = vrot.slane %v1089_v10, 1 }
 0x1f9   : > { %v1099_v15 = vrot.slane %v1098_v12, 1 }
 0x1fa   : > { %v1091_v17 = vadd.f32 %v1090_v13, %v1089_v10 }
 0x1fb   : > { %v1100_v18 = vadd.f32 %v1099_v15, %v1098_v12 }
 0x1fc   : > { %v1111_v19 = vadd.f32 %v1110_v16, %v1091_v17 }
 0x1fd   : > { %v1112_v21 = vadd.f32 %v1110_v16, %v1100_v18 }
 0x1ff   : > { %v1115_v22 = vcombine.low %v1111_v19, %v1112_v21 }
 0x201   : > { %v1122_v23 = vrot.slane %v1115_v22, %v1121_v20 }
 0x203   : > { %v1129_v24 = vrot.slane %v1122_v23, %v1121_v20 }
 0x205   : > { %1135 = vst.msk [vmem:[%s460_s13] sm:$0x3] %vm1133_vm11, %v1129_v24 }
 0x206 PF: > { %s23_s21 = sadd.s32 1, %s1346_s21   ;;  %s1605_s19 = smov %s1342_s20 }
 0x207   : > { %p20_p5 = scmp.ge.s32.totalorder %s23_s21, 4   ;;  %s1606_s20 = smov %s1608_s10 }
 0x209   :  { %22 = sbr.rel (!%p20_p5) target bundleno = 3 (0x3), region = 97 }

</bundles_post_ra>
